<compile_context>
chip_gen: v5e
topology: v5e:2x2
jax: 0.10.0
libtpu: 0.0.40
codegen_flags: <defaults>
</compile_context>

<pallas_src>
import math

import jax
import jax.numpy as jnp
from jax.experimental import pallas as pl
from jax.experimental.pallas import tpu as pltpu

LABEL_EMBED_DIM = 128     # cfg.WOBJ.LABEL_EMBED_DIM
NUM_ATTR_CLASSES = 101
HIDDEN = 512              # resnet34 feature size (fc.weight.size(1))
RESNET34_CFG = [(64, 3, 1), (128, 4, 2), (256, 6, 2), (512, 3, 2)]

NEG_BIG = -1e9            # bias for padded (never-selected) score columns


def _pick_tile(dim, candidates):
    for c in candidates:
        if dim % c == 0:
            return c
    return dim


# ---------------------------------------------------------------------------
# Pallas kernels
# ---------------------------------------------------------------------------
def _mm_kernel(relu, has_residual):
    """out = act(x @ w + bias [+ residual]); bf16 operands, f32 accumulate."""
    def kernel(x_ref, w_ref, bias_ref, *rest):
        if has_residual:
            res_ref, o_ref = rest
        else:
            (o_ref,) = rest
        acc = jnp.dot(x_ref[...], w_ref[...], preferred_element_type=jnp.float32)
        y = acc + bias_ref[...]
        if has_residual:
            y = y + res_ref[...].astype(jnp.float32)
        if relu:
            y = jnp.maximum(y, 0.0)
        o_ref[...] = y.astype(o_ref.dtype)
    return kernel


def matmul_bias(x, w, bias, residual=None, relu=False, out_dtype=jnp.bfloat16):
    """(M,K) @ (K,N) + bias[N] with optional residual/ReLU, tiled over (M,N)."""
    M, K = x.shape
    K2, N = w.shape
    assert K == K2
    TM = _pick_tile(M, (256, 128))
    TN = _pick_tile(N, (256, 128))          # 256-wide fills the v6e/v7x MXU
    grid = (M // TM, N // TN)
    bias2 = bias.reshape(1, N).astype(jnp.float32)
    in_specs = [
        pl.BlockSpec((TM, K), lambda i, j: (i, 0)),
        pl.BlockSpec((K, TN), lambda i, j: (0, j)),
        pl.BlockSpec((1, TN), lambda i, j: (0, j)),
    ]
    inputs = [x.astype(jnp.bfloat16), w.astype(jnp.bfloat16), bias2]
    if residual is not None:
        in_specs.append(pl.BlockSpec((TM, TN), lambda i, j: (i, j)))
        inputs.append(residual.astype(jnp.bfloat16))
    return pl.pallas_call(
        _mm_kernel(relu, residual is not None),
        out_shape=jax.ShapeDtypeStruct((M, N), out_dtype),
        grid=grid,
        in_specs=in_specs,
        out_specs=pl.BlockSpec((TM, TN), lambda i, j: (i, j)),
        compiler_params=pltpu.CompilerParams(
            dimension_semantics=("parallel", "parallel"),
            vmem_limit_bytes=48 * 1024 * 1024),
    )(*inputs)


def _max9_kernel(x_ref, o_ref):
    m = x_ref[0]
    for k in range(1, 9):
        m = jnp.maximum(m, x_ref[k])
    o_ref[...] = m


def max_over_9(stacked):  # (9, M, C) -> (M, C), tiled over M rows
    _, M, C = stacked.shape
    TM = _pick_tile(M, (512, 256, 128))
    return pl.pallas_call(
        _max9_kernel,
        out_shape=jax.ShapeDtypeStruct((M, C), stacked.dtype),
        grid=(M // TM,),
        in_specs=[pl.BlockSpec((9, TM, C), lambda i: (0, i, 0))],
        out_specs=pl.BlockSpec((TM, C), lambda i: (i, 0)),
        compiler_params=pltpu.CompilerParams(dimension_semantics=("parallel",)),
    )(stacked)


def _gap_kernel(x_ref, o_ref):
    o_ref[...] = jnp.mean(x_ref[...].astype(jnp.float32), axis=1)


def global_avg_pool(x):  # (N, HW, C) -> (N, C) f32, tiled over channels
    n, hw, c = x.shape
    TC = _pick_tile(c, (256, 128))
    return pl.pallas_call(
        _gap_kernel,
        out_shape=jax.ShapeDtypeStruct((n, c), jnp.float32),
        grid=(c // TC,),
        in_specs=[pl.BlockSpec((n, hw, TC), lambda j: (0, 0, j))],
        out_specs=pl.BlockSpec((n, TC), lambda j: (0, j)),
        compiler_params=pltpu.CompilerParams(dimension_semantics=("parallel",)),
    )(x)


def _mlp_head_kernel(x_ref, w1_ref, b1_ref, w2_ref, b2_ref, w3_ref, b3_ref, o_ref):
    h = jnp.dot(x_ref[...], w1_ref[...], preferred_element_type=jnp.float32)
    h = jnp.maximum(h + b1_ref[...], 0.0)
    h = jnp.dot(h.astype(jnp.bfloat16), w2_ref[...], preferred_element_type=jnp.float32)
    h = jnp.maximum(h + b2_ref[...], 0.0)
    y = jnp.dot(h.astype(jnp.bfloat16), w3_ref[...], preferred_element_type=jnp.float32)
    o_ref[...] = y + b3_ref[...]


def mlp_head(feat, params):
    """Fused 3-layer MLP head; output padded to a 128-wide lane-dense slab."""
    w1, b1 = params['mlp1']
    w2, b2 = params['mlp2']
    w3, b3 = params['mlp3']
    n_out = w3.shape[1]
    n_pad = ((n_out + 127) // 128) * 128
    w3p = jnp.pad(w3, ((0, 0), (0, n_pad - n_out)))
    b3p = jnp.concatenate([b3, jnp.full((n_pad - n_out,), NEG_BIG, b3.dtype)])
    B = feat.shape[0]
    return pl.pallas_call(
        _mlp_head_kernel,
        out_shape=jax.ShapeDtypeStruct((B, n_pad), jnp.float32),
    )(feat.astype(jnp.bfloat16),
      w1.astype(jnp.bfloat16), b1.reshape(1, -1).astype(jnp.float32),
      w2.astype(jnp.bfloat16), b2.reshape(1, -1).astype(jnp.float32),
      w3p.astype(jnp.bfloat16), b3p.reshape(1, -1).astype(jnp.float32))


def _ce_kernel(scores_ref, labels_ref, o_ref):
    s = scores_ref[...]                                   # (N, Cpad) f32
    labels = labels_ref[...]                              # (N, 1) i32
    m = jnp.max(s, axis=-1, keepdims=True)
    lse = jnp.log(jnp.sum(jnp.exp(s - m), axis=-1, keepdims=True)) + m
    col = jax.lax.broadcasted_iota(jnp.int32, s.shape, 1)
    picked = jnp.sum(jnp.where(col == labels, s, 0.0), axis=-1, keepdims=True)
    per = lse - picked                                    # (N, 1)
    valid = (labels != 0).astype(jnp.float32)             # ignore_index = 0
    num = jnp.sum(per * valid, axis=0, keepdims=True)
    den = jnp.maximum(jnp.sum(valid, axis=0, keepdims=True), 1.0)  # all-ignored guard
    o_ref[...] = num / den


def cross_entropy_ignore0(scores, labels):
    n, _ = scores.shape
    labels2 = labels.reshape(n, 1).astype(jnp.int32)
    out = pl.pallas_call(
        _ce_kernel,
        out_shape=jax.ShapeDtypeStruct((1, 1), jnp.float32),
    )(scores.astype(jnp.float32), labels2)
    return out[0, 0]


# ---------------------------------------------------------------------------
# Glue: im2col, conv+BN+act, pooling, ResNet34 backbone
# ---------------------------------------------------------------------------
def im2col(x, kh, kw, stride, pad, k_pad_to=None):
    n, h, w, c = x.shape
    xp = jnp.pad(x, ((0, 0), (pad, pad), (pad, pad), (0, 0)))
    oh = (h + 2 * pad - kh) // stride + 1
    ow = (w + 2 * pad - kw) // stride + 1
    cols = []
    for i in range(kh):
        for j in range(kw):
            cols.append(xp[:, i:i + stride * (oh - 1) + 1:stride,
                              j:j + stride * (ow - 1) + 1:stride, :])
    k = kh * kw * c
    if k_pad_to is not None and k_pad_to > k:
        cols.append(jnp.zeros((n, oh, ow, k_pad_to - k), x.dtype))
        k = k_pad_to
    patches = jnp.concatenate(cols, axis=-1)              # (N, oh, ow, K)
    return patches.reshape(n * oh * ow, k), oh, ow


def conv_bn_act(x, cb, *, stride, pad, relu, residual=None):
    w = cb['w']                                  # (kh,kw,cin,cout) BN-scaled bf16
    kh, kw_, cin, cout = w.shape
    K = kh * kw_ * cin
    # Lane-align small contraction dims (conv1 stem K=147, 1x1 downsample K=64).
    Kp = K if (K % 128 == 0 or K >= 256) else ((K + 127) // 128) * 128
    patches, oh, ow = im2col(x, kh, kw_, stride, pad, k_pad_to=Kp)
    w2 = w.reshape(K, cout)
    if Kp > K:
        w2 = jnp.pad(w2, ((0, Kp - K), (0, 0)))
    res2 = None
    if residual is not None:
        res2 = residual.reshape(residual.shape[0] * oh * ow, cout)
    out = matmul_bias(patches, w2, cb['b'], residual=res2, relu=relu)
    return out.reshape(x.shape[0], oh, ow, cout)


def max_pool_3x3_s2_p1(x):
    n, h, w, c = x.shape
    xp = jnp.pad(x, ((0, 0), (1, 1), (1, 1), (0, 0)), constant_values=-jnp.inf)
    oh = (h + 2 - 3) // 2 + 1
    ow = (w + 2 - 3) // 2 + 1
    slices = []
    for i in range(3):
        for j in range(3):
            slices.append(xp[:, i:i + 2 * (oh - 1) + 1:2,
                              j:j + 2 * (ow - 1) + 1:2, :])
    stacked = jnp.stack(slices, axis=0).reshape(9, n * oh * ow, c)
    return max_over_9(stacked).reshape(n, oh, ow, c)


def basic_block(x, blk):
    if 'down' in blk:
        shortcut = conv_bn_act(x, blk['down'], stride=blk['stride'], pad=0, relu=False)
    else:
        shortcut = x
    out = conv_bn_act(x, blk['cb1'], stride=blk['stride'], pad=1, relu=True)
    out = conv_bn_act(out, blk['cb2'], stride=1, pad=1, relu=True, residual=shortcut)
    return out


def resnet34_features(x_nchw, params):
    x = jnp.transpose(x_nchw, (0, 2, 3, 1)).astype(jnp.bfloat16)   # NCHW -> NHWC
    x = conv_bn_act(x, params['stem'], stride=2, pad=3, relu=True)
    x = max_pool_3x3_s2_p1(x)
    for blocks in params['layers']:
        for blk in blocks:
            x = basic_block(x, blk)
    n, h, w, c = x.shape
    return global_avg_pool(x.reshape(n, h * w, c))                 # (N, 512) f32


# ---------------------------------------------------------------------------
# Deterministic parameter construction (eval-mode BN folded into conv weights)
# ---------------------------------------------------------------------------
def _fold_bn(gamma, beta, mean, var, eps=1e-5):
    scale = gamma / jnp.sqrt(var + eps)
    return scale, beta - mean * scale


def _make_bn(key, c):
    k1, k2, k3, k4 = jax.random.split(key, 4)
    gamma = 1.0 + 0.1 * jax.random.normal(k1, (c,), jnp.float32)
    beta = 0.1 * jax.random.normal(k2, (c,), jnp.float32)
    mean = 0.1 * jax.random.normal(k3, (c,), jnp.float32)
    var = 1.0 + 0.1 * jax.random.uniform(k4, (c,), jnp.float32)
    return _fold_bn(gamma, beta, mean, var)


def _make_conv_bn(key, cin, cout, k):
    kc, kb = jax.random.split(key)
    std = math.sqrt(2.0 / (k * k * cin))
    w = std * jax.random.normal(kc, (k, k, cin, cout), jnp.float32)
    scale, shift = _make_bn(kb, cout)
    # Fold BN scale straight into the conv weights; kernel epilogue is bias-only.
    return {'w': (w * scale).astype(jnp.bfloat16), 'b': shift.astype(jnp.float32)}


def _make_linear(key, fin, fout):
    kw_, kb = jax.random.split(key)
    bound = 1.0 / math.sqrt(fin)
    w = jax.random.uniform(kw_, (fin, fout), jnp.float32, -bound, bound)
    b = jax.random.uniform(kb, (fout,), jnp.float32, -bound, bound)
    return w, b


def make_resnet34_params(key):
    keys = iter(jax.random.split(key, 200))
    params = {'stem': _make_conv_bn(next(keys), 3, 64, 7), 'layers': []}
    in_c = 64
    for planes, nblocks, stride in RESNET34_CFG:
        blocks = []
        for b in range(nblocks):
            s = stride if b == 0 else 1
            blk = {'stride': s,
                   'cb1': _make_conv_bn(next(keys), in_c, planes, 3),
                   'cb2': _make_conv_bn(next(keys), planes, planes, 3)}
            if s != 1 or in_c != planes:
                blk['down'] = _make_conv_bn(next(keys), in_c, planes, 1)
            blocks.append(blk)
            in_c = planes
        params['layers'].append(blocks)
    return params


def make_model_params(key):
    k_res, k_emb, k1, k2, k3 = jax.random.split(key, 5)
    return {
        'resnet': make_resnet34_params(k_res),
        'obj_emb': 0.1 * jax.random.normal(k_emb, (2000, LABEL_EMBED_DIM), jnp.float32),
        'mlp1': _make_linear(k1, HIDDEN + LABEL_EMBED_DIM, HIDDEN),
        'mlp2': _make_linear(k2, HIDDEN, HIDDEN),
        'mlp3': _make_linear(k3, HIDDEN, NUM_ATTR_CLASSES),
    }


# ---------------------------------------------------------------------------
# ResNetClassifierWObj.forward (weights=None path)
# ---------------------------------------------------------------------------
def forward(params, images, bbox_images, spatial_feat, attr_labels, obj_labels,
            weights=None):
    del images, spatial_feat, weights
    obj_emb = params['obj_emb'][obj_labels]                    # embedding gather (glue)
    feat = resnet34_features(bbox_images, params['resnet'])    # (N, 512) f32
    feat = jnp.concatenate([feat, obj_emb.astype(jnp.float32)], axis=-1)
    scores_padded = mlp_head(feat, params)                     # (N, 128), pads = -1e9
    attr_score = scores_padded[:, :NUM_ATTR_CLASSES]           # (N, 101)
    loss_attr = None
    if attr_labels is not None:
        loss_attr = cross_entropy_ignore0(scores_padded, attr_labels)
    return {'attr_score': attr_score, 'attr_loss': loss_attr, 'loss': loss_attr}


if __name__ == "__main__":
    key = jax.random.PRNGKey(0)
    kp, ki, ko, ka = jax.random.split(key, 4)
    params = make_model_params(kp)

    B = 2
    bbox_images = jax.random.normal(ki, (B, 3, 32, 32), jnp.float32)         # NCHW
    obj_labels = jax.random.randint(ko, (B,), 1, 2000, dtype=jnp.int32)
    attr_labels = jax.random.randint(ka, (B,), 1, NUM_ATTR_CLASSES, dtype=jnp.int32)

    out = forward(params, None, bbox_images, None, attr_labels, obj_labels)
    jax.block_until_ready((out['attr_score'], out['loss']))
    assert out['attr_score'].shape == (B, NUM_ATTR_CLASSES)
    assert out['loss'].shape == ()
    print("KERNEL_OK")
</pallas_src>

<mosaic_0001>
module attributes {stable_mosaic.version = 11 : i64} {
  func.func @kernel(%arg0: i32, %arg1: i32, %arg2: memref<256x256xbf16, #tpu.memory_space<vmem>>, %arg3: memref<256x64xbf16, #tpu.memory_space<vmem>>, %arg4: memref<1x64xf32, #tpu.memory_space<vmem>>, %arg5: memref<256x64xbf16, #tpu.memory_space<vmem>>) attributes {dimension_semantics = [#tpu.dimension_semantics<parallel>, #tpu.dimension_semantics<parallel>], iteration_bounds = array<i64: 2, 1>, scalar_prefetch = 0 : i64, scratch_operands = 0 : i64, tpu.core_type = #tpu.core_type<tc>, window_params = [{transform_indices = @transform_0, window_bounds = array<i64: 256, 256>}, {transform_indices = @transform_1, window_bounds = array<i64: 256, 64>}, {transform_indices = @transform_2, window_bounds = array<i64: 1, 64>}, {transform_indices = @transform_3, window_bounds = array<i64: 256, 64>}]} {
    %c0 = arith.constant 0 : index
    %c0_0 = arith.constant 0 : index
    %0 = vector.load %arg2[%c0, %c0_0] : memref<256x256xbf16, #tpu.memory_space<vmem>>, vector<256x256xbf16>
    %c0_1 = arith.constant 0 : index
    %c0_2 = arith.constant 0 : index
    %1 = vector.load %arg3[%c0_1, %c0_2] : memref<256x64xbf16, #tpu.memory_space<vmem>>, vector<256x64xbf16>
    %cst = arith.constant dense<0.000000e+00> : vector<256x64xf32>
    %2 = tpu.matmul %0, %1, %cst {dimension_numbers = #tpu.dot_dimension_numbers<[1], [0], [0], [1], [0, 0, 1, 1], [], []>} : vector<256x256xbf16>, vector<256x64xbf16>, vector<256x64xf32> -> vector<256x64xf32>
    %c0_3 = arith.constant 0 : index
    %c0_4 = arith.constant 0 : index
    %3 = vector.load %arg4[%c0_3, %c0_4] : memref<1x64xf32, #tpu.memory_space<vmem>>, vector<1x64xf32>
    %4 = vector.broadcast %3 : vector<1x64xf32> to vector<256x64xf32>
    %5 = arith.addf %2, %4 : vector<256x64xf32>
    %cst_5 = arith.constant 0.000000e+00 : f32
    %6 = vector.broadcast %cst_5 : f32 to vector<256x64xf32>
    %7 = arith.maximumf %5, %6 : vector<256x64xf32>
    %8 = arith.truncf %7 : vector<256x64xf32> to vector<256x64xbf16>
    %c0_6 = arith.constant 0 : index
    %c0_7 = arith.constant 0 : index
    %9 = vector.load %arg5[%c0_6, %c0_7] : memref<256x64xbf16, #tpu.memory_space<vmem>>, vector<256x64xbf16>
    tpu.vector_store %arg5[%c0_6, %c0_7], %8 {strides = array<i32>} : memref<256x64xbf16, #tpu.memory_space<vmem>>, vector<256x64xbf16>,
    return
  }
  func.func @transform_0(%arg0: i32, %arg1: i32) -> (i32, i32) {
    %c0_i32 = arith.constant 0 : i32
    %c0_i32_0 = arith.constant 0 : i32
    return %arg0, %c0_i32 : i32, i32
  }
  func.func @transform_1(%arg0: i32, %arg1: i32) -> (i32, i32) {
    %c0_i32 = arith.constant 0 : i32
    %c0_i32_0 = arith.constant 0 : i32
    return %c0_i32, %arg1 : i32, i32
  }
  func.func @transform_2(%arg0: i32, %arg1: i32) -> (i32, i32) {
    %c0_i32 = arith.constant 0 : i32
    %c0_i32_0 = arith.constant 0 : i32
    return %c0_i32, %arg1 : i32, i32
  }
  func.func @transform_3(%arg0: i32, %arg1: i32) -> (i32, i32) {
    %c0_i32 = arith.constant 0 : i32
    return %arg0, %arg1 : i32, i32
  }
}

</mosaic_0001>

<bundles_post_ra>
// kernel: tpu_custom_call.1
= control target key start
LH: loop header
LB: loop body
LE: loop exit
PB: predicated region body
PF: predicated region fallthrough
CT: control target
= control target key end

     0   :  { %8 = vsyncpa [#allocation3], 0  ;;  %s1699_s0 = inlined_call_operand.hbm [shape: bf16[512,256], index: 0, kind: input, shape index: {}]   ;;  %s1700_s1 = inlined_call_operand.vmem [shape: bf16[256,64], index: 1, kind: input, shape index: {}]   ;;  %s1701_s2 = inlined_call_operand.vmem [shape: f32[1,64], index: 2, kind: input, shape index: {}]   ;;  %s1702_s3 = inlined_call_operand.vmem [shape: bf16[512,64], index: 3, kind: output, shape index: {}]  }
   0x1   :  { %10 = vsyncpa [#allocation3 + $0x1], 0  ;;  %s1395_s12 = smov 0   ;;  %s1397_s13 = smov 0  }
   0x2   :  { %s1399_s14 = smov 0   ;;  %s1401_s15 = smov 0  }
   0x3   :  { %s1403_s16 = smov 0   ;;  %s1405_s17 = smov 0  }
   0x4 LB: > { %s959_s18 = sadd.s32 4294967295, %s1371_s17   ;;  %s28_s19 = sadd.s32 1, %s1367_s16  ;;  %s1371_s17 = sphi %s1405_s17, %s16_s17   ;;  %s1367_s16 = sphi %s1403_s16, %s1709_s16   ;;  %s1363_s15 = sphi %s1401_s15, %s1708_s15   ;;  %s1359_s14 = sphi %s1399_s14, %s1707_s14   ;;  %s1355_s13 = sphi %s1397_s13, %s1706_s13   ;;  %s1351_s12 = sphi %s1395_s12, %s1705_s12  }
   0x5   : > { %p30_p0 = scmp.ge.s32.totalorder %s28_s19, 2  ;;  %s35_s20 = sadd.s32 1, %s1359_s14 }
   0x6   : > { %p42_p1 = scmp.ne.s32.totalorder %s1359_s14, %s1355_s13  ;;  %p43_p2 = scmp.eq.s32.totalorder %s1371_s17, 0 }
   0x7   : > { %s1711_s19 = smov (%p30_p0, %s28_s19), 0  ;;  %p48_p4 = scmp.ne.s32.totalorder %s1355_s13, %s1351_s12 }
   0x8   : > { %p1431_p3 = por %p43_p2, %p42_p1  ;;  %s32_s22 = ssub.s32 %s1367_s16, %s1711_s19 }
   0x9   : > { %p49_p5 = scmp.eq.s32.totalorder %s959_s18, 0  ;;  %p33_p6 = scmp.eq.s32.totalorder %s32_s22, 0 }
   0xa   : > { %p1239_p8 = scmp.lt.s32.totalorder %s1371_s17, 2  ;;  %s165_s25 = sand.u32 1, %s1359_s14  }
   0xb   : > { %p1438_p7 = por %p49_p5, %p48_p4  ;;  %s1168_s26 = sshll.u32 %s1367_s16, 8 }
   0xc   : > { %s1444_s24 = scalar_select %p33_p6, %s1359_s14, %s35_s20  }
   0xd   : > { %s965_s27 = sshll.u32 %s165_s25, 8  ;;  %s175_s30 = scalar_lea.hbm %s1699_s0, %s1168_s26 }
   0xe   : > { %s176_s4 = sshll.u32 %s175_s30, 4  ;;  %s169_s5 = scalar_lea.vmem [#allocation2], %s965_s27  ;;  %s177_s4 = int_to_ptr.hbm [resolvable:$true] %s176_s4 }
   0xf   : > { %s178_s6 = sshll.u32 %s169_s5, 4  ;;  %p1236_p9 = pnand %p1239_p8, %p1431_p3  ;;  %s179_s6 = int_to_ptr.vmem [resolvable:$true] %s178_s6 }
  0x10   : > { %p969_p10 = scmp.ge.s32.totalorder %s1371_s17, 1  ;;  %p186_p11 = scmp.lt.s32.totalorder %s1371_s17, 3 }
  0x11   : > { %s166_s7 = scalar_lea.sflag [#allocation3], %s165_s25  ;;  %s1373_s8 = smov 128  }
  0x12   : > { %s1374_s9 = smov 8   ;;  %p187_p12 = pnand %p969_p10, %p186_p11 }
  0x13   : > { %1238 = dma.hbm_to_vmem [thread:$0]  (!%p1236_p9), %s177_s4, 4096, %s179_s6, %s166_s7, %s1373_s8, %s1373_s8, %s1374_s9  }
  0x14   : > { %190 = sbr.rel (%p187_p12) target bundleno = 319 (0x13f), region = 32  ;;  %s192_s10 = sand.u32 (!%p187_p12), 1, %s1355_s13  }
  0x15   : > { %s970_s11 = sshll.u32 (!%p187_p12), %s192_s10, 8  ;;  %s193_s12 = scalar_lea.sflag (!%p187_p12), [#allocation3], %s192_s10 }
  0x16   : > { %s1456_s18 = scalar_lea.vmem (!%p187_p12), [#allocation2], %s970_s11 }
  0x19   : > { %1346 = dma.done.wait (%p1438_p7), %s193_s12, 4096  }
  0x1a   : > { %1348 = vsyncadd (%p1438_p7), %s193_s12, 4294963200  ;;  %v1208_v0 = vld [vmem:[%s1700_s1 + $0x38] sm:$0xff]  ;;  %v1207_v2 = vld [vmem:[%s1700_s1 + $0x30] sm:$0xff]  ;;  %s971_s7 = sshll.u32 %s1363_s15, 5  ;;  %vm813_vm0 = vcmask 519168  }
  0x1b   : > { %v1216_v1 = vld [vmem:[%s1700_s1 + $0x78] sm:$0xff]  ;;  %571 = vmatpush.bf16.msra.mxu0 %v1208_v0  ;;  %1217 = vmatpush.bf16.msra.mxu2 %v1208_v0  ;;  %v1215_v3 = vld [vmem:[%s1700_s1 + $0x70] sm:$0xff]  ;;  %v1206_v4 = vld [vmem:[%s1700_s1 + $0x28] sm:$0xff]  ;;  %p239_p13 = scmp.lt.s32.totalorder %s971_s7, 63 }
  0x1c   : > { %660 = vmatpush.bf16.msra.mxu1 %v1216_v1  ;;  %1225 = vmatpush.bf16.msra.mxu3 %v1216_v1  ;;  %v1214_v5 = vld [vmem:[%s1700_s1 + $0x68] sm:$0xff]  ;;  %v1205_v6 = vld [vmem:[%s1700_s1 + $0x20] sm:$0xff]  ;;  %v1204_v8 = vld [vmem:[%s1700_s1 + $0x18] sm:$0xff] }
  0x1d   : > { %v1213_v7 = vld [vmem:[%s1700_s1 + $0x60] sm:$0xff]  ;;  %v1212_v9 = vld [vmem:[%s1700_s1 + $0x58] sm:$0xff]  ;;  %v1203_v10 = vld [vmem:[%s1700_s1 + $0x10] sm:$0xff]  ;;  %s1713_s7 = smov (!%p239_p13, %s971_s7), 63 }
  0x1e   : > { %v1211_v11 = vld [vmem:[%s1700_s1 + $0x50] sm:$0xff]  ;;  %v1202_v12 = vld [vmem:[%s1700_s1 + $0x8] sm:$0xff]  ;;  %v1201_v14 = vld [vmem:[%s1700_s1] sm:$0xff] }
  0x1f   : > { %572 = vmatpush.bf16.msra.mxu0 %v1207_v2  ;;  %1218 = vmatpush.bf16.msra.mxu2 %v1207_v2  ;;  %v1210_v13 = vld [vmem:[%s1700_s1 + $0x48] sm:$0xff]  ;;  %v1209_v15 = vld [vmem:[%s1700_s1 + $0x40] sm:$0xff]  ;;  %v983_v28 = vld [vmem:[%s1456_s18 + $0x10] sm:$0xf] }
  0x20   : > { %661 = vmatpush.bf16.msra.mxu1 %v1215_v3  ;;  %1226 = vmatpush.bf16.msra.mxu3 %v1215_v3  ;;  %v975_v16 = vld [vmem:[%s1456_s18] sm:$0xf]  ;;  %v1170_v17 = vld [vmem:[%s1456_s18 + $0x4] sm:$0xf0]  ;;  %v1169_v20 = vld [vmem:[%s1456_s18 + $0x4] sm:$0xf] }
  0x21   : > { %v1039_v18 = vld [vmem:[%s1456_s18 + $0x80] sm:$0xf]  ;;  %v1186_v19 = vld [vmem:[%s1456_s18 + $0x84] sm:$0xf0]  ;;  %v977_v21 = vld [vmem:[%s1456_s18 + $0x8] sm:$0xf0]  ;;  %v976_v24 = vor.u32 %v1170_v17, %v975_v16 }
  0x22   : > { %v1185_v22 = vld [vmem:[%s1456_s18 + $0x84] sm:$0xf]  ;;  %v1041_v23 = vld [vmem:[%s1456_s18 + $0x88] sm:$0xf0]  ;;  %v1040_v25 = vor.u32 %v1186_v19, %v1039_v18  ;;  %v980_v26 = vor.u32 %v1169_v20, %v977_v21  ;;  %v1172_v29 = vld [vmem:[%s1456_s18 + $0x14] sm:$0xf0] }
  0x23   : > { %573 = vmatpush.bf16.msra.mxu0 %v1206_v4  ;;  %1219 = vmatpush.bf16.msra.mxu2 %v1206_v4  ;;  %v1044_v27 = vor.u32 %v1185_v22, %v1041_v23  ;;  %v1047_v30 = vld [vmem:[%s1456_s18 + $0x90] sm:$0xf]  ;;  %v1188_v31 = vld [vmem:[%s1456_s18 + $0x94] sm:$0xf0]  ;;  %v1171_v32 = vld [vmem:[%s1456_s18 + $0x14] sm:$0xf]  ;;  %v984_v36 = vor.u32 %v1172_v29, %v983_v28 }
  0x24   : > { %662 = vmatpush.bf16.msra.mxu1 %v1214_v5  ;;  %1227 = vmatpush.bf16.msra.mxu3 %v1214_v5  ;;  %v985_v33 = vld [vmem:[%s1456_s18 + $0x18] sm:$0xf0]  ;;  %v1187_v34 = vld [vmem:[%s1456_s18 + $0x94] sm:$0xf]  ;;  %v1048_v37 = vor.u32 %v1188_v31, %v1047_v30  ;;  %v991_v40 = vld [vmem:[%s1456_s18 + $0x20] sm:$0xf] }
  0x25   : > { %v1049_v35 = vld [vmem:[%s1456_s18 + $0x98] sm:$0xf0]  ;;  %v988_v38 = vor.u32 %v1171_v32, %v985_v33  ;;  %v1174_v41 = vld [vmem:[%s1456_s18 + $0x24] sm:$0xf0]  ;;  %v1055_v42 = vld [vmem:[%s1456_s18 + $0xa0] sm:$0xf] }
  0x26   : > { %v1052_v39 = vor.u32 %v1187_v34, %v1049_v35  ;;  %v1190_v43 = vld [vmem:[%s1456_s18 + $0xa4] sm:$0xf0]  ;;  %v1173_v44 = vld [vmem:[%s1456_s18 + $0x24] sm:$0xf]  ;;  %v993_v45 = vld [vmem:[%s1456_s18 + $0x28] sm:$0xf0]  ;;  %v992_v48 = vor.u32 %v1174_v41, %v991_v40 }
  0x27   : > { %574 = vmatpush.bf16.msra.mxu0 %v1205_v6  ;;  %1220 = vmatpush.bf16.msra.mxu2 %v1205_v6  ;;  %v1189_v46 = vld [vmem:[%s1456_s18 + $0xa4] sm:$0xf]  ;;  %v1057_v47 = vld [vmem:[%s1456_s18 + $0xa8] sm:$0xf0]  ;;  %v1056_v49 = vor.u32 %v1190_v43, %v1055_v42  ;;  %v996_v50 = vor.u32 %v1173_v44, %v993_v45  ;;  %v999_v52 = vld [vmem:[%s1456_s18 + $0x30] sm:$0xf] }
  0x28   : > { %663 = vmatpush.bf16.msra.mxu1 %v1213_v7  ;;  %1228 = vmatpush.bf16.msra.mxu3 %v1213_v7  ;;  %v1060_v51 = vor.u32 %v1189_v46, %v1057_v47  ;;  %v1176_v53 = vld [vmem:[%s1456_s18 + $0x34] sm:$0xf0]  ;;  %v1063_v54 = vld [vmem:[%s1456_s18 + $0xb0] sm:$0xf]  ;;  %v1175_v56 = vld [vmem:[%s1456_s18 + $0x34] sm:$0xf] }
  0x29   : > { %v1192_v55 = vld [vmem:[%s1456_s18 + $0xb4] sm:$0xf0]  ;;  %v1001_v57 = vld [vmem:[%s1456_s18 + $0x38] sm:$0xf0]  ;;  %v1191_v58 = vld [vmem:[%s1456_s18 + $0xb4] sm:$0xf]  ;;  %v1000_v60 = vor.u32 %v1176_v53, %v999_v52 }
  0x2a   : > { %v1065_v59 = vld [vmem:[%s1456_s18 + $0xb8] sm:$0xf0]  ;;  %v1064_v61 = vor.u32 %v1192_v55, %v1063_v54  ;;  %v1004_v62 = vor.u32 %v1175_v56, %v1001_v57  ;;  %v1007_v0 = vld [vmem:[%s1456_s18 + $0x40] sm:$0xf]  ;;  %v1178_v1 = vld [vmem:[%s1456_s18 + $0x44] sm:$0xf0] }
  0x2b   : > { %575 = vmatpush.bf16.msra.mxu0 %v1204_v8  ;;  %1221 = vmatpush.bf16.msra.mxu2 %v1204_v8  ;;  %v1068_v63 = vor.u32 %v1191_v58, %v1065_v59  ;;  %v1071_v2 = vld [vmem:[%s1456_s18 + $0xc0] sm:$0xf]  ;;  %v1194_v3 = vld [vmem:[%s1456_s18 + $0xc4] sm:$0xf0]  ;;  %v1177_v4 = vld [vmem:[%s1456_s18 + $0x44] sm:$0xf]  ;;  %v1008_v8 = vor.u32 %v1178_v1, %v1007_v0 }
  0x2c   : > { %664 = vmatpush.bf16.msra.mxu1 %v1212_v9  ;;  %1229 = vmatpush.bf16.msra.mxu3 %v1212_v9  ;;  %v1009_v5 = vld [vmem:[%s1456_s18 + $0x48] sm:$0xf0]  ;;  %v1193_v6 = vld [vmem:[%s1456_s18 + $0xc4] sm:$0xf]  ;;  %v1072_v9 = vor.u32 %v1194_v3, %v1071_v2  ;;  %v1179_v16 = vld [vmem:[%s1456_s18 + $0x54] sm:$0xf] }
  0x2d   : > { %v1073_v7 = vld [vmem:[%s1456_s18 + $0xc8] sm:$0xf0]  ;;  %v1017_v17 = vld [vmem:[%s1456_s18 + $0x58] sm:$0xf0]  ;;  %v1195_v18 = vld [vmem:[%s1456_s18 + $0xd4] sm:$0xf] }
  0x2e   : > { %v1081_v19 = vld [vmem:[%s1456_s18 + $0xd8] sm:$0xf0]  ;;  %v1020_v22 = vor.u32 %v1179_v16, %v1017_v17  ;;  %v1181_v28 = vld [vmem:[%s1456_s18 + $0x64] sm:$0xf]  ;;  %v1025_v29 = vld [vmem:[%s1456_s18 + $0x68] sm:$0xf0] }
  0x2f   : > { %576 = vmatpush.bf16.msra.mxu0 %v1203_v10  ;;  %1222 = vmatpush.bf16.msra.mxu2 %v1203_v10  ;;  %v1012_v10 = vor.u32 %v1177_v4, %v1009_v5  ;;  %v1084_v23 = vor.u32 %v1195_v18, %v1081_v19  ;;  %v1197_v30 = vld [vmem:[%s1456_s18 + $0xe4] sm:$0xf]  ;;  %v1089_v31 = vld [vmem:[%s1456_s18 + $0xe8] sm:$0xf0]  ;;  %v1028_v34 = vor.u32 %v1181_v28, %v1025_v29  ;;  %v1183_v40 = vld [vmem:[%s1456_s18 + $0x74] sm:$0xf] }
  0x30   : > { %665 = vmatpush.bf16.msra.mxu1 %v1211_v11  ;;  %1230 = vmatpush.bf16.msra.mxu3 %v1211_v11  ;;  %v1076_v11 = vor.u32 %v1193_v6, %v1073_v7  ;;  %v1092_v35 = vor.u32 %v1197_v30, %v1089_v31  ;;  %v1033_v41 = vld [vmem:[%s1456_s18 + $0x78] sm:$0xf0]  ;;  %v1199_v42 = vld [vmem:[%s1456_s18 + $0xf4] sm:$0xf] }
  0x31   : > { %v1097_v43 = vld [vmem:[%s1456_s18 + $0xf8] sm:$0xf0]  ;;  %v1036_v46 = vor.u32 %v1183_v40, %v1033_v41 }
  0x32   : > { %v1100_v47 = vor.u32 %v1199_v42, %v1097_v43 }
  0x33   : > { %577 = vmatpush.bf16.msra.mxu0 %v1202_v12  ;;  %1223 = vmatpush.bf16.msra.mxu2 %v1202_v12  ;;  %v1015_v12 = vld [vmem:[%s1456_s18 + $0x50] sm:$0xf] }
  0x34   : > { %666 = vmatpush.bf16.msra.mxu1 %v1210_v13  ;;  %1231 = vmatpush.bf16.msra.mxu3 %v1210_v13  ;;  %v1180_v13 = vld [vmem:[%s1456_s18 + $0x54] sm:$0xf0] }
  0x35   : > { %v1016_v20 = vor.u32 %v1180_v13, %v1015_v12 }
  0x37   : > { %578 = vmatpush.bf16.msra.mxu0 %v1201_v14  ;;  %1224 = vmatpush.bf16.msra.mxu2 %v1201_v14  ;;  %v1079_v14 = vld [vmem:[%s1456_s18 + $0xd0] sm:$0xf] }
  0x38   : > { %667 = vmatpush.bf16.msra.mxu1 %v1209_v15  ;;  %1232 = vmatpush.bf16.msra.mxu3 %v1209_v15  ;;  %v1196_v15 = vld [vmem:[%s1456_s18 + $0xd4] sm:$0xf0] }
  0x39   : > { %v1080_v21 = vor.u32 %v1196_v15, %v1079_v14 }
  0x3a   : > { %579 = vmatmul.bf16.vlgmr.msra.gmra.mxu0 %v976_v24  ;;  %619 = vmatmul.bf16.vlgmr.msra.gmra.mxu2 %v1040_v25  ;;  %v1023_v24 = vld [vmem:[%s1456_s18 + $0x60] sm:$0xf]  ;;  %v1182_v25 = vld [vmem:[%s1456_s18 + $0x64] sm:$0xf0] }
  0x3b   : > { %668 = vmatmul.bf16.vlgmr.msra.gmra.mxu1 %v980_v26  ;;  %708 = vmatmul.bf16.vlgmr.msra.gmra.mxu3 %v1044_v27  ;;  %v1087_v26 = vld [vmem:[%s1456_s18 + $0xe0] sm:$0xf]  ;;  %v1198_v27 = vld [vmem:[%s1456_s18 + $0xe4] sm:$0xf0]  ;;  %v1024_v32 = vor.u32 %v1182_v25, %v1023_v24 }
  0x3c   : > { %v1088_v33 = vor.u32 %v1198_v27, %v1087_v26 }
  0x4a   : > { %584 = vmatmul.bf16.gmra.mxu0 %v984_v36  ;;  %624 = vmatmul.bf16.gmra.mxu2 %v1048_v37  ;;  %v1031_v36 = vld [vmem:[%s1456_s18 + $0x70] sm:$0xf]  ;;  %v1184_v37 = vld [vmem:[%s1456_s18 + $0x74] sm:$0xf0] }
  0x4b   : > { %673 = vmatmul.bf16.gmra.mxu1 %v988_v38  ;;  %713 = vmatmul.bf16.gmra.mxu3 %v1052_v39  ;;  %v1095_v38 = vld [vmem:[%s1456_s18 + $0xf0] sm:$0xf]  ;;  %v1200_v39 = vld [vmem:[%s1456_s18 + $0xf4] sm:$0xf0]  ;;  %v1032_v44 = vor.u32 %v1184_v37, %v1031_v36  ;;  %s972_s18 = sshll.u32 %s1713_s7, 2 }
  0x4c   : > { %v1096_v45 = vor.u32 %v1200_v39, %v1095_v38  ;;  %s1584_s12 = scalar_lea.vmem %s1702_s3, %s972_s18 }
  0x5a   : > { %589 = vmatmul.bf16.gmra.mxu0 %v992_v48  ;;  %629 = vmatmul.bf16.gmra.mxu2 %v1056_v49  ;;  %v1578_v48 = vld [vmem:[%s1701_s2] ss:$0 sm:$0xff] }
  0x5b   : > { %678 = vmatmul.bf16.gmra.mxu1 %v996_v50  ;;  %718 = vmatmul.bf16.gmra.mxu3 %v1060_v51 }
  0x6a   : > { %594 = vmatmul.bf16.gmra.mxu0 %v1000_v60  ;;  %634 = vmatmul.bf16.gmra.mxu2 %v1064_v61 }
  0x6b   : > { %683 = vmatmul.bf16.gmra.mxu1 %v1004_v62  ;;  %723 = vmatmul.bf16.gmra.mxu3 %v1068_v63 }
  0x7a   : > { %599 = vmatmul.bf16.gmra.mxu0 %v1008_v8  ;;  %639 = vmatmul.bf16.gmra.mxu2 %v1072_v9 }
  0x7b   : > { %688 = vmatmul.bf16.gmra.mxu1 %v1012_v10  ;;  %728 = vmatmul.bf16.gmra.mxu3 %v1076_v11 }
  0x8a   : > { %604 = vmatmul.bf16.gmra.mxu0 %v1016_v20  ;;  %644 = vmatmul.bf16.gmra.mxu2 %v1080_v21 }
  0x8b   : > { %693 = vmatmul.bf16.gmra.mxu1 %v1020_v22  ;;  %733 = vmatmul.bf16.gmra.mxu3 %v1084_v23 }
  0x9a   : > { %609 = vmatmul.bf16.gmra.mxu0 %v1024_v32  ;;  %649 = vmatmul.bf16.gmra.mxu2 %v1088_v33 }
  0x9b   : > { %698 = vmatmul.bf16.gmra.mxu1 %v1028_v34  ;;  %738 = vmatmul.bf16.gmra.mxu3 %v1092_v35 }
  0xaa   : > { %614 = vmatmul.bf16.gmra.mxu0 %v1032_v44  ;;  %654 = vmatmul.bf16.gmra.mxu2 %v1096_v45 }
  0xab   : > { %703 = vmatmul.bf16.gmra.mxu1 %v1036_v46  ;;  %743 = vmatmul.bf16.gmra.mxu3 %v1100_v47 }
  0xb7   : > { %v580_v49 = vpop.f32.mrf.mxu0 }
  0xb8   : > { %v581_v50 = vadd.f32 %v1578_v48, %v580_v49  ;;  %v669_v51 = vpop.f32.mrf.mxu1 }
  0xba   : > { %v670_v52 = vadd.f32 %v669_v51, %v581_v50 }
  0xbc   : > { %v749_v53 = vmax.f32 %v670_v52, 0.0 }
  0xbd   : > { %v620_v54 = vpop.f32.mrf.mxu2 }
  0xbe   : > { %v781_v55 = vpack.c.bf16 %v749_v53, %v749_v53  ;;  %v621_v56 = vadd.f32 %v1578_v48, %v620_v54  ;;  %v709_v57 = vpop.f32.mrf.mxu3 }
  0xbf   : > { %v582_v58 = vpop.f32.mrf.mxu0 }
  0xc0   : > { %814 = vst.msk [vmem:[%s1584_s12] sm:$0xf] %vm813_vm0, %v781_v55  ;;  %v710_v59 = vadd.f32 %v709_v57, %v621_v56  ;;  %v583_v60 = vadd.f32 %v1578_v48, %v582_v58  ;;  %v671_v61 = vpop.f32.mrf.mxu1 }
  0xc2   : > { %v765_v62 = vmax.f32 %v710_v59, 0.0  ;;  %v672_v63 = vadd.f32 %v671_v61, %v583_v60 }
  0xc4   : > { %v797_v0 = vpack.c.bf16 %v765_v62, %v765_v62  ;;  %v750_v1 = vmax.f32 %v672_v63, 0.0 }
  0xc5   : > { %v622_v2 = vpop.f32.mrf.mxu2 }
  0xc6   : > { %830 = vst.msk [vmem:[%s1584_s12 + $0x40] sm:$0xf] %vm813_vm0, %v797_v0  ;;  %v782_v3 = vpack.c.bf16 %v750_v1, %v750_v1  ;;  %v623_v4 = vadd.f32 %v1578_v48, %v622_v2  ;;  %v711_v5 = vpop.f32.mrf.mxu3 }
  0xc7   : > { %v585_v6 = vpop.f32.mrf.mxu0 }
  0xc8   : > { %815 = vst.msk [vmem:[%s1584_s12 + $0x4] sm:$0xf] %vm813_vm0, %v782_v3  ;;  %v712_v7 = vadd.f32 %v711_v5, %v623_v4  ;;  %v586_v8 = vadd.f32 %v1578_v48, %v585_v6  ;;  %v674_v9 = vpop.f32.mrf.mxu1 }
  0xca   : > { %v766_v10 = vmax.f32 %v712_v7, 0.0  ;;  %v675_v11 = vadd.f32 %v674_v9, %v586_v8 }
  0xcc   : > { %v798_v12 = vpack.c.bf16 %v766_v10, %v766_v10  ;;  %v751_v13 = vmax.f32 %v675_v11, 0.0 }
  0xcd   : > { %v625_v14 = vpop.f32.mrf.mxu2 }
  0xce   : > { %831 = vst.msk [vmem:[%s1584_s12 + $0x44] sm:$0xf] %vm813_vm0, %v798_v12  ;;  %v783_v15 = vpack.c.bf16 %v751_v13, %v751_v13  ;;  %v626_v16 = vadd.f32 %v1578_v48, %v625_v14  ;;  %v714_v17 = vpop.f32.mrf.mxu3 }
  0xcf   : > { %v587_v18 = vpop.f32.mrf.mxu0 }
  0xd0   : > { %816 = vst.msk [vmem:[%s1584_s12 + $0x8] sm:$0xf] %vm813_vm0, %v783_v15  ;;  %v715_v19 = vadd.f32 %v714_v17, %v626_v16  ;;  %v588_v20 = vadd.f32 %v1578_v48, %v587_v18  ;;  %v676_v21 = vpop.f32.mrf.mxu1 }
  0xd2   : > { %v767_v22 = vmax.f32 %v715_v19, 0.0  ;;  %v677_v23 = vadd.f32 %v676_v21, %v588_v20 }
  0xd4   : > { %v799_v24 = vpack.c.bf16 %v767_v22, %v767_v22  ;;  %v752_v25 = vmax.f32 %v677_v23, 0.0 }
  0xd5   : > { %v627_v26 = vpop.f32.mrf.mxu2 }
  0xd6   : > { %832 = vst.msk [vmem:[%s1584_s12 + $0x48] sm:$0xf] %vm813_vm0, %v799_v24  ;;  %v784_v27 = vpack.c.bf16 %v752_v25, %v752_v25  ;;  %v628_v28 = vadd.f32 %v1578_v48, %v627_v26  ;;  %v716_v29 = vpop.f32.mrf.mxu3 }
  0xd7   : > { %v590_v30 = vpop.f32.mrf.mxu0 }
  0xd8   : > { %817 = vst.msk [vmem:[%s1584_s12 + $0xc] sm:$0xf] %vm813_vm0, %v784_v27  ;;  %v717_v31 = vadd.f32 %v716_v29, %v628_v28  ;;  %v591_v32 = vadd.f32 %v1578_v48, %v590_v30  ;;  %v679_v33 = vpop.f32.mrf.mxu1 }
  0xda   : > { %v768_v34 = vmax.f32 %v717_v31, 0.0  ;;  %v680_v35 = vadd.f32 %v679_v33, %v591_v32 }
  0xdc   : > { %v800_v36 = vpack.c.bf16 %v768_v34, %v768_v34  ;;  %v753_v37 = vmax.f32 %v680_v35, 0.0 }
  0xdd   : > { %v630_v38 = vpop.f32.mrf.mxu2 }
  0xde   : > { %833 = vst.msk [vmem:[%s1584_s12 + $0x4c] sm:$0xf] %vm813_vm0, %v800_v36  ;;  %v785_v39 = vpack.c.bf16 %v753_v37, %v753_v37  ;;  %v631_v40 = vadd.f32 %v1578_v48, %v630_v38  ;;  %v719_v41 = vpop.f32.mrf.mxu3 }
  0xdf   : > { %v592_v42 = vpop.f32.mrf.mxu0 }
  0xe0   : > { %818 = vst.msk [vmem:[%s1584_s12 + $0x10] sm:$0xf] %vm813_vm0, %v785_v39  ;;  %v720_v43 = vadd.f32 %v719_v41, %v631_v40  ;;  %v593_v44 = vadd.f32 %v1578_v48, %v592_v42  ;;  %v681_v45 = vpop.f32.mrf.mxu1 }
  0xe2   : > { %v769_v46 = vmax.f32 %v720_v43, 0.0  ;;  %v682_v47 = vadd.f32 %v681_v45, %v593_v44 }
  0xe4   : > { %v801_v49 = vpack.c.bf16 %v769_v46, %v769_v46  ;;  %v754_v50 = vmax.f32 %v682_v47, 0.0 }
  0xe5   : > { %v632_v51 = vpop.f32.mrf.mxu2 }
  0xe6   : > { %834 = vst.msk [vmem:[%s1584_s12 + $0x50] sm:$0xf] %vm813_vm0, %v801_v49  ;;  %v786_v52 = vpack.c.bf16 %v754_v50, %v754_v50  ;;  %v633_v53 = vadd.f32 %v1578_v48, %v632_v51  ;;  %v721_v54 = vpop.f32.mrf.mxu3 }
  0xe7   : > { %v595_v55 = vpop.f32.mrf.mxu0 }
  0xe8   : > { %819 = vst.msk [vmem:[%s1584_s12 + $0x14] sm:$0xf] %vm813_vm0, %v786_v52  ;;  %v722_v56 = vadd.f32 %v721_v54, %v633_v53  ;;  %v596_v57 = vadd.f32 %v1578_v48, %v595_v55  ;;  %v684_v58 = vpop.f32.mrf.mxu1 }
  0xea   : > { %v770_v59 = vmax.f32 %v722_v56, 0.0  ;;  %v685_v60 = vadd.f32 %v684_v58, %v596_v57 }
  0xec   : > { %v802_v61 = vpack.c.bf16 %v770_v59, %v770_v59  ;;  %v755_v62 = vmax.f32 %v685_v60, 0.0 }
  0xed   : > { %v635_v63 = vpop.f32.mrf.mxu2 }
  0xee   : > { %835 = vst.msk [vmem:[%s1584_s12 + $0x54] sm:$0xf] %vm813_vm0, %v802_v61  ;;  %v787_v0 = vpack.c.bf16 %v755_v62, %v755_v62  ;;  %v636_v1 = vadd.f32 %v1578_v48, %v635_v63  ;;  %v724_v2 = vpop.f32.mrf.mxu3 }
  0xef   : > { %v597_v3 = vpop.f32.mrf.mxu0 }
  0xf0   : > { %820 = vst.msk [vmem:[%s1584_s12 + $0x18] sm:$0xf] %vm813_vm0, %v787_v0  ;;  %v725_v4 = vadd.f32 %v724_v2, %v636_v1  ;;  %v598_v5 = vadd.f32 %v1578_v48, %v597_v3  ;;  %v686_v6 = vpop.f32.mrf.mxu1 }
  0xf2   : > { %v771_v7 = vmax.f32 %v725_v4, 0.0  ;;  %v687_v8 = vadd.f32 %v686_v6, %v598_v5 }
  0xf4   : > { %v803_v9 = vpack.c.bf16 %v771_v7, %v771_v7  ;;  %v756_v10 = vmax.f32 %v687_v8, 0.0 }
  0xf5   : > { %v637_v11 = vpop.f32.mrf.mxu2 }
  0xf6   : > { %836 = vst.msk [vmem:[%s1584_s12 + $0x58] sm:$0xf] %vm813_vm0, %v803_v9  ;;  %v788_v12 = vpack.c.bf16 %v756_v10, %v756_v10  ;;  %v638_v13 = vadd.f32 %v1578_v48, %v637_v11  ;;  %v726_v14 = vpop.f32.mrf.mxu3 }
  0xf7   : > { %v600_v15 = vpop.f32.mrf.mxu0 }
  0xf8   : > { %821 = vst.msk [vmem:[%s1584_s12 + $0x1c] sm:$0xf] %vm813_vm0, %v788_v12  ;;  %v727_v16 = vadd.f32 %v726_v14, %v638_v13  ;;  %v601_v17 = vadd.f32 %v1578_v48, %v600_v15  ;;  %v689_v18 = vpop.f32.mrf.mxu1 }
  0xfa   : > { %v772_v19 = vmax.f32 %v727_v16, 0.0  ;;  %v690_v20 = vadd.f32 %v689_v18, %v601_v17 }
  0xfc   : > { %v804_v21 = vpack.c.bf16 %v772_v19, %v772_v19  ;;  %v757_v22 = vmax.f32 %v690_v20, 0.0 }
  0xfd   : > { %v640_v23 = vpop.f32.mrf.mxu2 }
  0xfe   : > { %837 = vst.msk [vmem:[%s1584_s12 + $0x5c] sm:$0xf] %vm813_vm0, %v804_v21  ;;  %v789_v24 = vpack.c.bf16 %v757_v22, %v757_v22  ;;  %v641_v25 = vadd.f32 %v1578_v48, %v640_v23  ;;  %v729_v26 = vpop.f32.mrf.mxu3 }
  0xff   : > { %v602_v27 = vpop.f32.mrf.mxu0 }
 0x100   : > { %822 = vst.msk [vmem:[%s1584_s12 + $0x20] sm:$0xf] %vm813_vm0, %v789_v24  ;;  %v730_v28 = vadd.f32 %v729_v26, %v641_v25  ;;  %v603_v29 = vadd.f32 %v1578_v48, %v602_v27  ;;  %v691_v30 = vpop.f32.mrf.mxu1 }
 0x102   : > { %v773_v31 = vmax.f32 %v730_v28, 0.0  ;;  %v692_v32 = vadd.f32 %v691_v30, %v603_v29 }
 0x104   : > { %v805_v33 = vpack.c.bf16 %v773_v31, %v773_v31  ;;  %v758_v34 = vmax.f32 %v692_v32, 0.0 }
 0x105   : > { %v642_v35 = vpop.f32.mrf.mxu2 }
 0x106   : > { %838 = vst.msk [vmem:[%s1584_s12 + $0x60] sm:$0xf] %vm813_vm0, %v805_v33  ;;  %v790_v36 = vpack.c.bf16 %v758_v34, %v758_v34  ;;  %v643_v37 = vadd.f32 %v1578_v48, %v642_v35  ;;  %v731_v38 = vpop.f32.mrf.mxu3 }
 0x107   : > { %v605_v39 = vpop.f32.mrf.mxu0 }
 0x108   : > { %823 = vst.msk [vmem:[%s1584_s12 + $0x24] sm:$0xf] %vm813_vm0, %v790_v36  ;;  %v732_v40 = vadd.f32 %v731_v38, %v643_v37  ;;  %v606_v41 = vadd.f32 %v1578_v48, %v605_v39  ;;  %v694_v42 = vpop.f32.mrf.mxu1 }
 0x10a   : > { %v774_v43 = vmax.f32 %v732_v40, 0.0  ;;  %v695_v44 = vadd.f32 %v694_v42, %v606_v41 }
 0x10c   : > { %v806_v45 = vpack.c.bf16 %v774_v43, %v774_v43  ;;  %v759_v46 = vmax.f32 %v695_v44, 0.0 }
 0x10d   : > { %v645_v47 = vpop.f32.mrf.mxu2 }
 0x10e   : > { %839 = vst.msk [vmem:[%s1584_s12 + $0x64] sm:$0xf] %vm813_vm0, %v806_v45  ;;  %v791_v49 = vpack.c.bf16 %v759_v46, %v759_v46  ;;  %v646_v50 = vadd.f32 %v1578_v48, %v645_v47  ;;  %v734_v51 = vpop.f32.mrf.mxu3 }
 0x10f   : > { %v607_v52 = vpop.f32.mrf.mxu0 }
 0x110   : > { %824 = vst.msk [vmem:[%s1584_s12 + $0x28] sm:$0xf] %vm813_vm0, %v791_v49  ;;  %v735_v53 = vadd.f32 %v734_v51, %v646_v50  ;;  %v608_v54 = vadd.f32 %v1578_v48, %v607_v52  ;;  %v696_v55 = vpop.f32.mrf.mxu1 }
 0x112   : > { %v775_v56 = vmax.f32 %v735_v53, 0.0  ;;  %v697_v57 = vadd.f32 %v696_v55, %v608_v54 }
 0x114   : > { %v807_v58 = vpack.c.bf16 %v775_v56, %v775_v56  ;;  %v760_v59 = vmax.f32 %v697_v57, 0.0 }
 0x115   : > { %v647_v60 = vpop.f32.mrf.mxu2 }
 0x116   : > { %840 = vst.msk [vmem:[%s1584_s12 + $0x68] sm:$0xf] %vm813_vm0, %v807_v58  ;;  %v792_v61 = vpack.c.bf16 %v760_v59, %v760_v59  ;;  %v648_v62 = vadd.f32 %v1578_v48, %v647_v60  ;;  %v736_v63 = vpop.f32.mrf.mxu3 }
 0x117   : > { %v610_v0 = vpop.f32.mrf.mxu0 }
 0x118   : > { %825 = vst.msk [vmem:[%s1584_s12 + $0x2c] sm:$0xf] %vm813_vm0, %v792_v61  ;;  %v737_v1 = vadd.f32 %v736_v63, %v648_v62  ;;  %v611_v2 = vadd.f32 %v1578_v48, %v610_v0  ;;  %v699_v3 = vpop.f32.mrf.mxu1 }
 0x11a   : > { %v776_v4 = vmax.f32 %v737_v1, 0.0  ;;  %v700_v5 = vadd.f32 %v699_v3, %v611_v2 }
 0x11c   : > { %v808_v6 = vpack.c.bf16 %v776_v4, %v776_v4  ;;  %v761_v7 = vmax.f32 %v700_v5, 0.0 }
 0x11d   : > { %v650_v8 = vpop.f32.mrf.mxu2 }
 0x11e   : > { %841 = vst.msk [vmem:[%s1584_s12 + $0x6c] sm:$0xf] %vm813_vm0, %v808_v6  ;;  %v793_v9 = vpack.c.bf16 %v761_v7, %v761_v7  ;;  %v651_v10 = vadd.f32 %v1578_v48, %v650_v8  ;;  %v739_v11 = vpop.f32.mrf.mxu3 }
 0x11f   : > { %v612_v12 = vpop.f32.mrf.mxu0 }
 0x120   : > { %826 = vst.msk [vmem:[%s1584_s12 + $0x30] sm:$0xf] %vm813_vm0, %v793_v9  ;;  %v740_v13 = vadd.f32 %v739_v11, %v651_v10  ;;  %v613_v14 = vadd.f32 %v1578_v48, %v612_v12  ;;  %v701_v15 = vpop.f32.mrf.mxu1 }
 0x122   : > { %v777_v16 = vmax.f32 %v740_v13, 0.0  ;;  %v702_v17 = vadd.f32 %v701_v15, %v613_v14 }
 0x124   : > { %v809_v18 = vpack.c.bf16 %v777_v16, %v777_v16  ;;  %v762_v19 = vmax.f32 %v702_v17, 0.0 }
 0x125   : > { %v652_v20 = vpop.f32.mrf.mxu2 }
 0x126   : > { %842 = vst.msk [vmem:[%s1584_s12 + $0x70] sm:$0xf] %vm813_vm0, %v809_v18  ;;  %v794_v21 = vpack.c.bf16 %v762_v19, %v762_v19  ;;  %v653_v22 = vadd.f32 %v1578_v48, %v652_v20  ;;  %v741_v23 = vpop.f32.mrf.mxu3 }
 0x127   : > { %v615_v24 = vpop.f32.mrf.mxu0 }
 0x128   : > { %827 = vst.msk [vmem:[%s1584_s12 + $0x34] sm:$0xf] %vm813_vm0, %v794_v21  ;;  %v742_v25 = vadd.f32 %v741_v23, %v653_v22  ;;  %v616_v26 = vadd.f32 %v1578_v48, %v615_v24  ;;  %v704_v27 = vpop.f32.mrf.mxu1 }
 0x12a   : > { %v778_v28 = vmax.f32 %v742_v25, 0.0  ;;  %v705_v29 = vadd.f32 %v704_v27, %v616_v26 }
 0x12c   : > { %v810_v30 = vpack.c.bf16 %v778_v28, %v778_v28  ;;  %v763_v31 = vmax.f32 %v705_v29, 0.0 }
 0x12d   : > { %v655_v32 = vpop.f32.mrf.mxu2 }
 0x12e   : > { %843 = vst.msk [vmem:[%s1584_s12 + $0x74] sm:$0xf] %vm813_vm0, %v810_v30  ;;  %v795_v33 = vpack.c.bf16 %v763_v31, %v763_v31  ;;  %v656_v34 = vadd.f32 %v1578_v48, %v655_v32  ;;  %v744_v35 = vpop.f32.mrf.mxu3 }
 0x12f   : > { %v617_v36 = vpop.f32.mrf.mxu0 }
 0x130   : > { %828 = vst.msk [vmem:[%s1584_s12 + $0x38] sm:$0xf] %vm813_vm0, %v795_v33  ;;  %v745_v37 = vadd.f32 %v744_v35, %v656_v34  ;;  %v618_v38 = vadd.f32 %v1578_v48, %v617_v36  ;;  %v706_v39 = vpop.f32.mrf.mxu1 }
 0x132   : > { %v779_v40 = vmax.f32 %v745_v37, 0.0  ;;  %v707_v41 = vadd.f32 %v706_v39, %v618_v38 }
 0x134   : > { %v811_v42 = vpack.c.bf16 %v779_v40, %v779_v40  ;;  %v764_v43 = vmax.f32 %v707_v41, 0.0 }
 0x135   : > { %v657_v44 = vpop.f32.mrf.mxu2 }
 0x136   : > { %844 = vst.msk [vmem:[%s1584_s12 + $0x78] sm:$0xf] %vm813_vm0, %v811_v42  ;;  %v796_v45 = vpack.c.bf16 %v764_v43, %v764_v43  ;;  %v658_v46 = vadd.f32 %v1578_v48, %v657_v44  ;;  %v746_v47 = vpop.f32.mrf.mxu3 }
 0x138   : > { %829 = vst.msk [vmem:[%s1584_s12 + $0x3c] sm:$0xf] %vm813_vm0, %v796_v45  ;;  %v747_v49 = vadd.f32 %v746_v47, %v658_v46 }
 0x13a   : > { %v780_v50 = vmax.f32 %v747_v49, 0.0 }
 0x13c   : > { %v812_v51 = vpack.c.bf16 %v780_v50, %v780_v50 }
 0x13e   : > { %845 = vst.msk [vmem:[%s1584_s12 + $0x7c] sm:$0xf] %vm813_vm0, %v812_v51 }
 0x13f PF: > { %s16_s17 = sadd.s32 1, %s1371_s17   ;;  %s1705_s12 = smov %s1355_s13 }
 0x140   : > { %p13_p0 = scmp.ge.s32.totalorder %s16_s17, 4   ;;  %s1706_s13 = smov %s1359_s14 }
 0x141   : > { %s1707_s14 = smov %s1444_s24  ;;  %s1708_s15 = smov %s1367_s16 }
 0x142   : > { %s1709_s16 = smov %s1711_s19  ;;  %15 = sbr.rel (!%p13_p0) target bundleno = 4 (0x4), region = 78 }
 0x147   :  { %874 = vsyncpa [#allocation3], 1 }
 0x148   :  { %876 = vsyncpa [#allocation3 + $0x1], 1 }

</bundles_post_ra>
